<compile_context>
chip_gen: v5e
topology: v5e:2x2
jax: 0.10.0
libtpu: 0.0.40
codegen_flags: <defaults>
</compile_context>

<pallas_src>
import functools

import jax
import jax.numpy as jnp
from jax import lax
from jax.experimental import pallas as pl
from jax.experimental.pallas import tpu as pltpu


# ----------------------------- kernel --------------------------------------- #

def _attention_kernel(*refs, heads, dim_head, bias_heads, block_q):
    """One (batch, query-tile) step: Q proj + per-head attention + fused output proj."""
    if bias_heads:
        (x_full_ref, x_q_ref, w_q_ref, w_kv_ref, bias_ref,
         w_proj_ref, b_proj_ref, o_ref, kv_ref) = refs
    else:
        (x_full_ref, x_q_ref, w_q_ref, w_kv_ref,
         w_proj_ref, b_proj_ref, o_ref, kv_ref) = refs
        bias_ref = None

    inner = heads * dim_head

    # K/V projection for this batch element, computed once per batch (the
    # q-tile axis is innermost, so qi == 0 is the first step after every change
    # of the batch index).  Stored bf16 in a scratch that persists across steps.
    @pl.when(pl.program_id(1) == 0)
    def _():
        kv = jnp.dot(x_full_ref[0], w_kv_ref[...],
                     preferred_element_type=jnp.float32)          # (N, 2*inner)
        kv_ref[...] = kv.astype(jnp.bfloat16)

    # Q projection for this query tile (softmax scale pre-folded into w_q).
    q = jnp.dot(x_q_ref[0], w_q_ref[...],
                preferred_element_type=jnp.float32).astype(jnp.bfloat16)  # (TQ, inner)

    d_model = o_ref.shape[-1]
    y = jnp.zeros((block_q, d_model), jnp.float32)

    # Static head loop with static (lane-aligned) slices.  Accumulating into a
    # single (TQ, D) carry keeps per-head temporaries dead after each iteration
    # (addresses the unbounded-liveness concern of the old concat structure).
    for h in range(heads):
        lo = h * dim_head
        q_h = q[:, lo:lo + dim_head]                              # (TQ, dh) bf16
        k_h = kv_ref[:, lo:lo + dim_head]                         # (N,  dh) bf16
        v_h = kv_ref[:, inner + lo:inner + lo + dim_head]         # (N,  dh) bf16

        # q @ k^T without materializing a transpose: contract the last dims.
        dots = lax.dot_general(q_h, k_h, (((1,), (1,)), ((), ())),
                               preferred_element_type=jnp.float32)  # (TQ, N) f32
        if bias_ref is not None:
            dots = dots + bias_ref[h if bias_heads > 1 else 0].astype(jnp.float32)

        # Numerically stable softmax, kept in f32 (exact divide for correctness;
        # dropout(p=0.0) is the identity).
        m = jnp.max(dots, axis=-1, keepdims=True)
        p = jnp.exp(dots - m)
        attn = p / jnp.sum(p, axis=-1, keepdims=True)

        pv = jnp.dot(attn.astype(jnp.bfloat16), v_h,
                     preferred_element_type=jnp.float32)            # (TQ, dh)
        # Fuse this head's slice of the output projection into the accumulator.
        y = y + jnp.dot(pv.astype(jnp.bfloat16),
                        w_proj_ref[lo:lo + dim_head, :],
                        preferred_element_type=jnp.float32)          # (TQ, D)

    y = y + b_proj_ref[...]                                          # (1, D) broadcast
    o_ref[0] = y.astype(o_ref.dtype)


# ----------------------------- wrapper -------------------------------------- #

def attention_forward(x, w_qkv, w_proj, b_proj, pathway_bias=None, *,
                      heads, dim_head, block_q=None):
    """x: (B, N, D).  w_qkv: (3*inner, D) torch layout.  w_proj: (D, inner), b_proj: (D,)."""
    B, N, D = x.shape
    inner = heads * dim_head
    scale = float(dim_head) ** -0.5

    # Choose a query tile: full-N block, or a divisor of N that is a multiple of
    # 16 sublanes (bf16 granule) when tiling.
    if block_q is None or N % block_q != 0 or (block_q != N and block_q % 16 != 0):
        block_q = N
    num_q = N // block_q

    # torch Linear computes y = x @ W^T -> pre-transpose once on the host.
    # Fold the softmax scale into the Q columns, cast MXU operands to bf16.
    w_qkv_t = jnp.transpose(w_qkv).astype(jnp.float32)         # (D, 3*inner)
    w_q_t = (w_qkv_t[:, :inner] * scale).astype(jnp.bfloat16)  # (D, inner)
    w_kv_t = w_qkv_t[:, inner:].astype(jnp.bfloat16)           # (D, 2*inner)
    w_proj_t = jnp.transpose(w_proj).astype(jnp.bfloat16)      # (inner, D)
    b_proj_2d = b_proj.reshape(1, D).astype(jnp.float32)
    x_bf16 = x.astype(jnp.bfloat16)

    in_specs = [
        pl.BlockSpec((1, N, D), lambda b, qi: (b, 0, 0)),          # x (full, K/V source)
        pl.BlockSpec((1, block_q, D), lambda b, qi: (b, qi, 0)),   # x (query tile)
        pl.BlockSpec((D, inner), lambda b, qi: (0, 0)),            # Wq (scaled)
        pl.BlockSpec((D, 2 * inner), lambda b, qi: (0, 0)),        # Wkv
    ]
    args = [x_bf16, x_bf16, w_q_t, w_kv_t]

    bias_heads = 0
    bias_bytes = 0
    if pathway_bias is not None:
        pb = jnp.asarray(pathway_bias)
        assert pb.ndim == 3 and pb.shape[-2:] == (N, N) and pb.shape[0] in (1, heads), \
            "pathway_bias must be (heads|1, N, N)"
        bias_heads = int(pb.shape[0])
        pb_bf16 = pb.astype(jnp.bfloat16)                          # compact dtype
        in_specs.append(
            pl.BlockSpec((bias_heads, block_q, N), lambda b, qi: (0, qi, 0)))
        args.append(pb_bf16)
        bias_bytes = bias_heads * N * N * 2

    in_specs += [
        pl.BlockSpec((inner, D), lambda b, qi: (0, 0)),            # Wproj
        pl.BlockSpec((1, D), lambda b, qi: (0, 0)),                # bproj
    ]
    args += [w_proj_t, b_proj_2d]

    kernel = functools.partial(_attention_kernel, heads=heads, dim_head=dim_head,
                               bias_heads=bias_heads, block_q=block_q)

    # Advisory cost estimate (per whole call).
    flops = B * (2 * N * D * 3 * inner                 # qkv projection
                 + heads * (2 * N * N * dim_head) * 2  # qk^T and attn @ v
                 + 2 * N * inner * D)                  # output projection
    transcendentals = B * heads * N * N
    bytes_accessed = (2 * B * N * D * 2                # x read twice (full + tiles)
                      + (D * 3 * inner + inner * D) * 2 + D * 4
                      + bias_bytes
                      + B * N * D * x.dtype.itemsize)  # output

    # Per-step VMEM working set (double-buffered inputs + scratch), with headroom.
    vmem_est = (2 * N * D * 2 + 2 * block_q * D * 2
                + 2 * D * 3 * inner * 2 + 2 * inner * D * 2 + 2 * D * 4
                + (2 * bias_heads * block_q * N * 2 if bias_heads else 0)
                + 2 * block_q * D * x.dtype.itemsize
                + N * 2 * inner * 2)
    vmem_limit = int(min(64 * 1024 * 1024, max(32 * 1024 * 1024, 4 * vmem_est)))

    return pl.pallas_call(
        kernel,
        out_shape=jax.ShapeDtypeStruct((B, N, D), x.dtype),
        grid_spec=pltpu.PrefetchScalarGridSpec(
            num_scalar_prefetch=0,
            grid=(B, num_q),
            in_specs=in_specs,
            out_specs=pl.BlockSpec((1, block_q, D), lambda b, qi: (b, qi, 0)),
            scratch_shapes=[pltpu.VMEM((N, 2 * inner), jnp.bfloat16)],  # K/V cache
        ),
        compiler_params=pltpu.CompilerParams(
            # qi axis must stay in-order per batch (K/V scratch init at qi == 0).
            dimension_semantics=("parallel", "arbitrary"),
            vmem_limit_bytes=vmem_limit),
        cost_estimate=pl.CostEstimate(flops=flops,
                                      transcendentals=transcendentals,
                                      bytes_accessed=bytes_accessed),
    )(*args)


# ------------------- reference (module structure, matched precision) --------- #

def _reference(x, w_qkv, w_proj, b_proj, pathway_bias, *, heads, dim_head):
    """Pure-JAX reference in the original module's structure, with operands cast
    to bf16 at the same points as the kernel (f32 accumulation everywhere)."""
    B, N, D = x.shape
    inner = heads * dim_head
    scale = float(dim_head) ** -0.5
    f32, bf16 = jnp.float32, jnp.bfloat16

    w_qkv_t = jnp.transpose(w_qkv).astype(f32)              # (D, 3*inner)
    w_qkv_t = w_qkv_t.at[:, :inner].multiply(scale)         # scale folded like kernel
    qkv = jnp.einsum("bnd,de->bne", x.astype(bf16), w_qkv_t.astype(bf16),
                     preferred_element_type=f32).astype(bf16)
    q, k, v = jnp.split(qkv, 3, axis=-1)

    def rearr(t):  # 'b n (h d) -> b h n d'
        return jnp.transpose(t.reshape(B, N, heads, dim_head), (0, 2, 1, 3))

    q, k, v = rearr(q), rearr(k), rearr(v)
    dots = jnp.einsum("bhid,bhjd->bhij", q, k, preferred_element_type=f32)
    if pathway_bias is not None:
        dots = dots + pathway_bias.astype(bf16).astype(f32)
    attn = jax.nn.softmax(dots, axis=-1)                     # dropout(0.0) -> identity
    out = jnp.einsum("bhij,bhjd->bhid", attn.astype(bf16), v,
                     preferred_element_type=f32)
    out = jnp.transpose(out, (0, 2, 1, 3)).reshape(B, N, inner)
    y = jnp.einsum("bne,ed->bnd", out.astype(bf16),
                   jnp.transpose(w_proj).astype(bf16),
                   preferred_element_type=f32) + b_proj.astype(f32)
    return y.astype(x.dtype)


# ----------------------------- main ------------------------------------------ #

if __name__ == "__main__":
    def run_case(*, B, N, dim, heads, dim_head, with_bias, block_q):
        inner = heads * dim_head
        key = jax.random.PRNGKey(0)
        kx, kw1, kw2, kb2, kpb = jax.random.split(key, 5)
        x = jax.random.normal(kx, (B, N, dim), dtype=jnp.float32)
        # nn.Linear shapes: weight (out, in), bias (out,)
        w_qkv = jax.random.normal(kw1, (3 * inner, dim), dtype=jnp.float32) * (dim ** -0.5)
        w_proj = jax.random.normal(kw2, (dim, inner), dtype=jnp.float32) * (inner ** -0.5)
        b_proj = jax.random.normal(kb2, (dim,), dtype=jnp.float32) * 0.01
        pathway_bias = (jax.random.normal(kpb, (heads, N, N), dtype=jnp.float32) * 0.1
                        if with_bias else None)

        out = attention_forward(x, w_qkv, w_proj, b_proj, pathway_bias,
                                heads=heads, dim_head=dim_head, block_q=block_q)
        out = jax.block_until_ready(out)
        ref = _reference(x, w_qkv, w_proj, b_proj, pathway_bias,
                         heads=heads, dim_head=dim_head)
        assert out.shape == (B, N, dim)
        assert jnp.allclose(out, ref, atol=1e-2, rtol=1e-2), \
            f"mismatch vs reference (bias={with_bias}, N={N}, block_q={block_q})"

    # module-like small config, with and without pathway_bias
    run_case(B=2, N=8, dim=32, heads=4, dim_head=16, with_bias=True, block_q=None)
    run_case(B=2, N=8, dim=32, heads=4, dim_head=16, with_bias=False, block_q=None)
    # exercises the query-tile grid axis (2 q-tiles) + persistent K/V scratch
    run_case(B=1, N=32, dim=32, heads=4, dim_head=16, with_bias=True, block_q=16)

    # TODO(synk): pathway_transform (nn.Linear) is defined in __init__ but never
    # used in forward, so it is intentionally not implemented.
    print("KERNEL_OK")
</pallas_src>

<mosaic_0001>
module attributes {stable_mosaic.version = 11 : i64} {
  func.func @_attention_kernel(%arg0: i32, %arg1: i32, %arg2: memref<1x8x32xbf16, #tpu.memory_space<vmem>>, %arg3: memref<1x8x32xbf16, #tpu.memory_space<vmem>>, %arg4: memref<32x64xbf16, #tpu.memory_space<vmem>>, %arg5: memref<32x128xbf16, #tpu.memory_space<vmem>>, %arg6: memref<4x8x8xbf16, #tpu.memory_space<vmem>>, %arg7: memref<64x32xbf16, #tpu.memory_space<vmem>>, %arg8: memref<1x32xf32, #tpu.memory_space<vmem>>, %arg9: memref<1x8x32xf32, #tpu.memory_space<vmem>>, %arg10: memref<8x128xbf16, #tpu.memory_space<vmem>>) attributes {dimension_semantics = [#tpu.dimension_semantics<parallel>, #tpu.dimension_semantics<arbitrary>], iteration_bounds = array<i64: 2, 1>, scalar_prefetch = 0 : i64, scratch_operands = 1 : i64, tpu.core_type = #tpu.core_type<tc>, window_params = [{transform_indices = @transform_0, window_bounds = array<i64: 1, 8, 32>}, {transform_indices = @transform_1, window_bounds = array<i64: 1, 8, 32>}, {pipeline_mode = #tpu.pipeline_mode<synchronous>, transform_indices = @transform_2, window_bounds = array<i64: 32, 64>}, {pipeline_mode = #tpu.pipeline_mode<synchronous>, transform_indices = @transform_3, window_bounds = array<i64: 32, 128>}, {transform_indices = @transform_4, window_bounds = array<i64: 4, 8, 8>}, {pipeline_mode = #tpu.pipeline_mode<synchronous>, transform_indices = @transform_5, window_bounds = array<i64: 64, 32>}, {pipeline_mode = #tpu.pipeline_mode<synchronous>, transform_indices = @transform_6, window_bounds = array<i64: 1, 32>}, {transform_indices = @transform_7, window_bounds = array<i64: 1, 8, 32>}]} {
    %c0_i32 = arith.constant 0 : i32
    %0 = arith.cmpi eq, %arg1, %c0_i32 : i32
    %1 = arith.extui %0 : i1 to i32
    %c0_i32_0 = arith.constant 0 : i32
    %2 = arith.cmpi ne, %1, %c0_i32_0 : i32
    scf.if %2 {
      %c0_57 = arith.constant 0 : index
      %c0_58 = arith.constant 0 : index
      %c0_59 = arith.constant 0 : index
      %107 = vector.load %arg2[%c0_57, %c0_58, %c0_59] : memref<1x8x32xbf16, #tpu.memory_space<vmem>>, vector<1x8x32xbf16>
      %108 = vector.shape_cast %107 : vector<1x8x32xbf16> to vector<8x32xbf16>
      %c0_60 = arith.constant 0 : index
      %c0_61 = arith.constant 0 : index
      %109 = vector.load %arg5[%c0_60, %c0_61] : memref<32x128xbf16, #tpu.memory_space<vmem>>, vector<32x128xbf16>
      %cst_62 = arith.constant dense<0.000000e+00> : vector<8x128xf32>
      %110 = tpu.matmul %108, %109, %cst_62 {dimension_numbers = #tpu.dot_dimension_numbers<[1], [0], [0], [1], [0, 0, 1, 1], [], []>} : vector<8x32xbf16>, vector<32x128xbf16>, vector<8x128xf32> -> vector<8x128xf32>
      %111 = arith.truncf %110 : vector<8x128xf32> to vector<8x128xbf16>
      %c0_63 = arith.constant 0 : index
      %c0_64 = arith.constant 0 : index
      %112 = vector.load %arg10[%c0_63, %c0_64] : memref<8x128xbf16, #tpu.memory_space<vmem>>, vector<8x128xbf16>
      tpu.vector_store %arg10[%c0_63, %c0_64], %111 {strides = array<i32>} : memref<8x128xbf16, #tpu.memory_space<vmem>>, vector<8x128xbf16>,
    } else {
    }
    %c0 = arith.constant 0 : index
    %c0_1 = arith.constant 0 : index
    %c0_2 = arith.constant 0 : index
    %3 = vector.load %arg3[%c0, %c0_1, %c0_2] : memref<1x8x32xbf16, #tpu.memory_space<vmem>>, vector<1x8x32xbf16>
    %4 = vector.shape_cast %3 : vector<1x8x32xbf16> to vector<8x32xbf16>
    %c0_3 = arith.constant 0 : index
    %c0_4 = arith.constant 0 : index
    %5 = vector.load %arg4[%c0_3, %c0_4] : memref<32x64xbf16, #tpu.memory_space<vmem>>, vector<32x64xbf16>
    %cst = arith.constant dense<0.000000e+00> : vector<8x64xf32>
    %6 = tpu.matmul %4, %5, %cst {dimension_numbers = #tpu.dot_dimension_numbers<[1], [0], [0], [1], [0, 0, 1, 1], [], []>} : vector<8x32xbf16>, vector<32x64xbf16>, vector<8x64xf32> -> vector<8x64xf32>
    %7 = arith.truncf %6 : vector<8x64xf32> to vector<8x64xbf16>
    %cst_5 = arith.constant 0.000000e+00 : f32
    %8 = vector.broadcast %cst_5 : f32 to vector<8x32xf32>
    %9 = vector.extract_strided_slice %7 {offsets = [0, 0], sizes = [8, 16], strides = [1, 1]} : vector<8x64xbf16> to vector<8x16xbf16>
    %c0_6 = arith.constant 0 : index
    %c0_7 = arith.constant 0 : index
    %10 = vector.load %arg10[%c0_6, %c0_7] : memref<8x128xbf16, #tpu.memory_space<vmem>>, vector<8x16xbf16>
    %c0_8 = arith.constant 0 : index
    %c64 = arith.constant 64 : index
    %11 = vector.load %arg10[%c0_8, %c64] : memref<8x128xbf16, #tpu.memory_space<vmem>>, vector<8x16xbf16>
    %cst_9 = arith.constant dense<0.000000e+00> : vector<8x8xf32>
    %12 = tpu.matmul %9, %10, %cst_9 {dimension_numbers = #tpu.dot_dimension_numbers<[1], [1], [0], [0], [0, 0, 1, 0], [], []>} : vector<8x16xbf16>, vector<8x16xbf16>, vector<8x8xf32> -> vector<8x8xf32>
    %c0_10 = arith.constant 0 : index
    %c0_11 = arith.constant 0 : index
    %c0_12 = arith.constant 0 : index
    %13 = vector.load %arg6[%c0_10, %c0_11, %c0_12] : memref<4x8x8xbf16, #tpu.memory_space<vmem>>, vector<1x8x8xbf16>
    %14 = vector.shape_cast %13 : vector<1x8x8xbf16> to vector<8x8xbf16>
    %15 = arith.extf %14 : vector<8x8xbf16> to vector<8x8xf32>
    %16 = arith.addf %12, %15 : vector<8x8xf32>
    %cst_13 = arith.constant dense<0xFF800000> : vector<8xf32>
    %17 = vector.multi_reduction <maximumf>, %16, %cst_13 [1] : vector<8x8xf32> to vector<8xf32>
    %18 = vector.shape_cast %17 : vector<8xf32> to vector<8x1xf32>
    %19 = vector.broadcast %18 : vector<8x1xf32> to vector<8x8xf32>
    %20 = arith.subf %16, %19 : vector<8x8xf32>
    %21 = math.exp %20 : vector<8x8xf32>
    %cst_14 = arith.constant dense<0.000000e+00> : vector<8xf32>
    %22 = vector.multi_reduction <add>, %21, %cst_14 [1] : vector<8x8xf32> to vector<8xf32>
    %23 = vector.shape_cast %22 : vector<8xf32> to vector<8x1xf32>
    %24 = vector.broadcast %23 : vector<8x1xf32> to vector<8x8xf32>
    %25 = arith.divf %21, %24 : vector<8x8xf32>
    %26 = arith.truncf %25 : vector<8x8xf32> to vector<8x8xbf16>
    %cst_15 = arith.constant dense<0.000000e+00> : vector<8x16xf32>
    %27 = tpu.matmul %26, %11, %cst_15 {dimension_numbers = #tpu.dot_dimension_numbers<[1], [0], [0], [1], [0, 0, 1, 1], [], []>} : vector<8x8xbf16>, vector<8x16xbf16>, vector<8x16xf32> -> vector<8x16xf32>
    %28 = arith.truncf %27 : vector<8x16xf32> to vector<8x16xbf16>
    %c0_16 = arith.constant 0 : index
    %c0_17 = arith.constant 0 : index
    %29 = vector.load %arg7[%c0_16, %c0_17] : memref<64x32xbf16, #tpu.memory_space<vmem>>, vector<16x32xbf16>
    %cst_18 = arith.constant dense<0.000000e+00> : vector<8x32xf32>
    %30 = tpu.matmul %28, %29, %cst_18 {dimension_numbers = #tpu.dot_dimension_numbers<[1], [0], [0], [1], [0, 0, 1, 1], [], []>} : vector<8x16xbf16>, vector<16x32xbf16>, vector<8x32xf32> -> vector<8x32xf32>
    %31 = arith.addf %8, %30 : vector<8x32xf32>
    %32 = vector.extract_strided_slice %7 {offsets = [0, 16], sizes = [8, 16], strides = [1, 1]} : vector<8x64xbf16> to vector<8x16xbf16>
    %c0_19 = arith.constant 0 : index
    %c16 = arith.constant 16 : index
    %33 = vector.load %arg10[%c0_19, %c16] : memref<8x128xbf16, #tpu.memory_space<vmem>>, vector<8x16xbf16>
    %c0_20 = arith.constant 0 : index
    %c80 = arith.constant 80 : index
    %34 = vector.load %arg10[%c0_20, %c80] : memref<8x128xbf16, #tpu.memory_space<vmem>>, vector<8x16xbf16>
    %cst_21 = arith.constant dense<0.000000e+00> : vector<8x8xf32>
    %35 = tpu.matmul %32, %33, %cst_21 {dimension_numbers = #tpu.dot_dimension_numbers<[1], [1], [0], [0], [0, 0, 1, 0], [], []>} : vector<8x16xbf16>, vector<8x16xbf16>, vector<8x8xf32> -> vector<8x8xf32>
    %c1 = arith.constant 1 : index
    %c0_22 = arith.constant 0 : index
    %c0_23 = arith.constant 0 : index
    %36 = vector.load %arg6[%c1, %c0_22, %c0_23] : memref<4x8x8xbf16, #tpu.memory_space<vmem>>, vector<1x8x8xbf16>
    %37 = vector.shape_cast %36 : vector<1x8x8xbf16> to vector<8x8xbf16>
    %38 = arith.extf %37 : vector<8x8xbf16> to vector<8x8xf32>
    %39 = arith.addf %35, %38 : vector<8x8xf32>
    %cst_24 = arith.constant dense<0xFF800000> : vector<8xf32>
    %40 = vector.multi_reduction <maximumf>, %39, %cst_24 [1] : vector<8x8xf32> to vector<8xf32>
    %41 = vector.shape_cast %40 : vector<8xf32> to vector<8x1xf32>
    %42 = vector.broadcast %41 : vector<8x1xf32> to vector<8x8xf32>
    %43 = arith.subf %39, %42 : vector<8x8xf32>
    %44 = math.exp %43 : vector<8x8xf32>
    %cst_25 = arith.constant dense<0.000000e+00> : vector<8xf32>
    %45 = vector.multi_reduction <add>, %44, %cst_25 [1] : vector<8x8xf32> to vector<8xf32>
    %46 = vector.shape_cast %45 : vector<8xf32> to vector<8x1xf32>
    %47 = vector.broadcast %46 : vector<8x1xf32> to vector<8x8xf32>
    %48 = arith.divf %44, %47 : vector<8x8xf32>
    %49 = arith.truncf %48 : vector<8x8xf32> to vector<8x8xbf16>
    %cst_26 = arith.constant dense<0.000000e+00> : vector<8x16xf32>
    %50 = tpu.matmul %49, %34, %cst_26 {dimension_numbers = #tpu.dot_dimension_numbers<[1], [0], [0], [1], [0, 0, 1, 1], [], []>} : vector<8x8xbf16>, vector<8x16xbf16>, vector<8x16xf32> -> vector<8x16xf32>
    %51 = arith.truncf %50 : vector<8x16xf32> to vector<8x16xbf16>
    %c16_27 = arith.constant 16 : index
    %c0_28 = arith.constant 0 : index
    %52 = vector.load %arg7[%c16_27, %c0_28] : memref<64x32xbf16, #tpu.memory_space<vmem>>, vector<16x32xbf16>
    %cst_29 = arith.constant dense<0.000000e+00> : vector<8x32xf32>
    %53 = tpu.matmul %51, %52, %cst_29 {dimension_numbers = #tpu.dot_dimension_numbers<[1], [0], [0], [1], [0, 0, 1, 1], [], []>} : vector<8x16xbf16>, vector<16x32xbf16>, vector<8x32xf32> -> vector<8x32xf32>
    %54 = arith.addf %31, %53 : vector<8x32xf32>
    %55 = vector.extract_strided_slice %7 {offsets = [0, 32], sizes = [8, 16], strides = [1, 1]} : vector<8x64xbf16> to vector<8x16xbf16>
    %c0_30 = arith.constant 0 : index
    %c32 = arith.constant 32 : index
    %56 = vector.load %arg10[%c0_30, %c32] : memref<8x128xbf16, #tpu.memory_space<vmem>>, vector<8x16xbf16>
    %c0_31 = arith.constant 0 : index
    %c96 = arith.constant 96 : index
    %57 = vector.load %arg10[%c0_31, %c96] : memref<8x128xbf16, #tpu.memory_space<vmem>>, vector<8x16xbf16>
    %cst_32 = arith.constant dense<0.000000e+00> : vector<8x8xf32>
    %58 = tpu.matmul %55, %56, %cst_32 {dimension_numbers = #tpu.dot_dimension_numbers<[1], [1], [0], [0], [0, 0, 1, 0], [], []>} : vector<8x16xbf16>, vector<8x16xbf16>, vector<8x8xf32> -> vector<8x8xf32>
    %c2 = arith.constant 2 : index
    %c0_33 = arith.constant 0 : index
    %c0_34 = arith.constant 0 : index
    %59 = vector.load %arg6[%c2, %c0_33, %c0_34] : memref<4x8x8xbf16, #tpu.memory_space<vmem>>, vector<1x8x8xbf16>
    %60 = vector.shape_cast %59 : vector<1x8x8xbf16> to vector<8x8xbf16>
    %61 = arith.extf %60 : vector<8x8xbf16> to vector<8x8xf32>
    %62 = arith.addf %58, %61 : vector<8x8xf32>
    %cst_35 = arith.constant dense<0xFF800000> : vector<8xf32>
    %63 = vector.multi_reduction <maximumf>, %62, %cst_35 [1] : vector<8x8xf32> to vector<8xf32>
    %64 = vector.shape_cast %63 : vector<8xf32> to vector<8x1xf32>
    %65 = vector.broadcast %64 : vector<8x1xf32> to vector<8x8xf32>
    %66 = arith.subf %62, %65 : vector<8x8xf32>
    %67 = math.exp %66 : vector<8x8xf32>
    %cst_36 = arith.constant dense<0.000000e+00> : vector<8xf32>
    %68 = vector.multi_reduction <add>, %67, %cst_36 [1] : vector<8x8xf32> to vector<8xf32>
    %69 = vector.shape_cast %68 : vector<8xf32> to vector<8x1xf32>
    %70 = vector.broadcast %69 : vector<8x1xf32> to vector<8x8xf32>
    %71 = arith.divf %67, %70 : vector<8x8xf32>
    %72 = arith.truncf %71 : vector<8x8xf32> to vector<8x8xbf16>
    %cst_37 = arith.constant dense<0.000000e+00> : vector<8x16xf32>
    %73 = tpu.matmul %72, %57, %cst_37 {dimension_numbers = #tpu.dot_dimension_numbers<[1], [0], [0], [1], [0, 0, 1, 1], [], []>} : vector<8x8xbf16>, vector<8x16xbf16>, vector<8x16xf32> -> vector<8x16xf32>
    %74 = arith.truncf %73 : vector<8x16xf32> to vector<8x16xbf16>
    %c32_38 = arith.constant 32 : index
    %c0_39 = arith.constant 0 : index
    %75 = vector.load %arg7[%c32_38, %c0_39] : memref<64x32xbf16, #tpu.memory_space<vmem>>, vector<16x32xbf16>
    %cst_40 = arith.constant dense<0.000000e+00> : vector<8x32xf32>
    %76 = tpu.matmul %74, %75, %cst_40 {dimension_numbers = #tpu.dot_dimension_numbers<[1], [0], [0], [1], [0, 0, 1, 1], [], []>} : vector<8x16xbf16>, vector<16x32xbf16>, vector<8x32xf32> -> vector<8x32xf32>
    %77 = arith.addf %54, %76 : vector<8x32xf32>
    %78 = vector.extract_strided_slice %7 {offsets = [0, 48], sizes = [8, 16], strides = [1, 1]} : vector<8x64xbf16> to vector<8x16xbf16>
    %c0_41 = arith.constant 0 : index
    %c48 = arith.constant 48 : index
    %79 = vector.load %arg10[%c0_41, %c48] : memref<8x128xbf16, #tpu.memory_space<vmem>>, vector<8x16xbf16>
    %c0_42 = arith.constant 0 : index
    %c112 = arith.constant 112 : index
    %80 = vector.load %arg10[%c0_42, %c112] : memref<8x128xbf16, #tpu.memory_space<vmem>>, vector<8x16xbf16>
    %cst_43 = arith.constant dense<0.000000e+00> : vector<8x8xf32>
    %81 = tpu.matmul %78, %79, %cst_43 {dimension_numbers = #tpu.dot_dimension_numbers<[1], [1], [0], [0], [0, 0, 1, 0], [], []>} : vector<8x16xbf16>, vector<8x16xbf16>, vector<8x8xf32> -> vector<8x8xf32>
    %c3 = arith.constant 3 : index
    %c0_44 = arith.constant 0 : index
    %c0_45 = arith.constant 0 : index
    %82 = vector.load %arg6[%c3, %c0_44, %c0_45] : memref<4x8x8xbf16, #tpu.memory_space<vmem>>, vector<1x8x8xbf16>
    %83 = vector.shape_cast %82 : vector<1x8x8xbf16> to vector<8x8xbf16>
    %84 = arith.extf %83 : vector<8x8xbf16> to vector<8x8xf32>
    %85 = arith.addf %81, %84 : vector<8x8xf32>
    %cst_46 = arith.constant dense<0xFF800000> : vector<8xf32>
    %86 = vector.multi_reduction <maximumf>, %85, %cst_46 [1] : vector<8x8xf32> to vector<8xf32>
    %87 = vector.shape_cast %86 : vector<8xf32> to vector<8x1xf32>
    %88 = vector.broadcast %87 : vector<8x1xf32> to vector<8x8xf32>
    %89 = arith.subf %85, %88 : vector<8x8xf32>
    %90 = math.exp %89 : vector<8x8xf32>
    %cst_47 = arith.constant dense<0.000000e+00> : vector<8xf32>
    %91 = vector.multi_reduction <add>, %90, %cst_47 [1] : vector<8x8xf32> to vector<8xf32>
    %92 = vector.shape_cast %91 : vector<8xf32> to vector<8x1xf32>
    %93 = vector.broadcast %92 : vector<8x1xf32> to vector<8x8xf32>
    %94 = arith.divf %90, %93 : vector<8x8xf32>
    %95 = arith.truncf %94 : vector<8x8xf32> to vector<8x8xbf16>
    %cst_48 = arith.constant dense<0.000000e+00> : vector<8x16xf32>
    %96 = tpu.matmul %95, %80, %cst_48 {dimension_numbers = #tpu.dot_dimension_numbers<[1], [0], [0], [1], [0, 0, 1, 1], [], []>} : vector<8x8xbf16>, vector<8x16xbf16>, vector<8x16xf32> -> vector<8x16xf32>
    %97 = arith.truncf %96 : vector<8x16xf32> to vector<8x16xbf16>
    %c48_49 = arith.constant 48 : index
    %c0_50 = arith.constant 0 : index
    %98 = vector.load %arg7[%c48_49, %c0_50] : memref<64x32xbf16, #tpu.memory_space<vmem>>, vector<16x32xbf16>
    %cst_51 = arith.constant dense<0.000000e+00> : vector<8x32xf32>
    %99 = tpu.matmul %97, %98, %cst_51 {dimension_numbers = #tpu.dot_dimension_numbers<[1], [0], [0], [1], [0, 0, 1, 1], [], []>} : vector<8x16xbf16>, vector<16x32xbf16>, vector<8x32xf32> -> vector<8x32xf32>
    %100 = arith.addf %77, %99 : vector<8x32xf32>
    %c0_52 = arith.constant 0 : index
    %c0_53 = arith.constant 0 : index
    %101 = vector.load %arg8[%c0_52, %c0_53] : memref<1x32xf32, #tpu.memory_space<vmem>>, vector<1x32xf32>
    %102 = vector.broadcast %101 : vector<1x32xf32> to vector<8x32xf32>
    %103 = arith.addf %100, %102 : vector<8x32xf32>
    %c0_54 = arith.constant 0 : index
    %c0_55 = arith.constant 0 : index
    %c0_56 = arith.constant 0 : index
    %104 = vector.load %arg9[%c0_54, %c0_55, %c0_56] : memref<1x8x32xf32, #tpu.memory_space<vmem>>, vector<1x8x32xf32>
    %105 = vector.shape_cast %104 : vector<1x8x32xf32> to vector<8x32xf32>
    %106 = vector.shape_cast %103 : vector<8x32xf32> to vector<1x8x32xf32>
    tpu.vector_store %arg9[%c0_54, %c0_55, %c0_56], %106 {strides = array<i32>} : memref<1x8x32xf32, #tpu.memory_space<vmem>>, vector<1x8x32xf32>,
    return
  }
  func.func @transform_0(%arg0: i32, %arg1: i32) -> (i32, i32, i32) {
    %c0_i32 = arith.constant 0 : i32
    %c0_i32_0 = arith.constant 0 : i32
    %c0_i32_1 = arith.constant 0 : i32
    return %arg0, %c0_i32, %c0_i32_0 : i32, i32, i32
  }
  func.func @transform_1(%arg0: i32, %arg1: i32) -> (i32, i32, i32) {
    %c0_i32 = arith.constant 0 : i32
    %c0_i32_0 = arith.constant 0 : i32
    return %arg0, %arg1, %c0_i32 : i32, i32, i32
  }
  func.func @transform_2(%arg0: i32, %arg1: i32) -> (i32, i32) {
    %c0_i32 = arith.constant 0 : i32
    %c0_i32_0 = arith.constant 0 : i32
    %c0_i32_1 = arith.constant 0 : i32
    return %c0_i32, %c0_i32_0 : i32, i32
  }
  func.func @transform_3(%arg0: i32, %arg1: i32) -> (i32, i32) {
    %c0_i32 = arith.constant 0 : i32
    %c0_i32_0 = arith.constant 0 : i32
    %c0_i32_1 = arith.constant 0 : i32
    return %c0_i32, %c0_i32_0 : i32, i32
  }
  func.func @transform_4(%arg0: i32, %arg1: i32) -> (i32, i32, i32) {
    %c0_i32 = arith.constant 0 : i32
    %c0_i32_0 = arith.constant 0 : i32
    %c0_i32_1 = arith.constant 0 : i32
    return %c0_i32, %arg1, %c0_i32_0 : i32, i32, i32
  }
  func.func @transform_5(%arg0: i32, %arg1: i32) -> (i32, i32) {
    %c0_i32 = arith.constant 0 : i32
    %c0_i32_0 = arith.constant 0 : i32
    %c0_i32_1 = arith.constant 0 : i32
    return %c0_i32, %c0_i32_0 : i32, i32
  }
  func.func @transform_6(%arg0: i32, %arg1: i32) -> (i32, i32) {
    %c0_i32 = arith.constant 0 : i32
    %c0_i32_0 = arith.constant 0 : i32
    %c0_i32_1 = arith.constant 0 : i32
    return %c0_i32, %c0_i32_0 : i32, i32
  }
  func.func @transform_7(%arg0: i32, %arg1: i32) -> (i32, i32, i32) {
    %c0_i32 = arith.constant 0 : i32
    %c0_i32_0 = arith.constant 0 : i32
    return %arg0, %arg1, %c0_i32 : i32, i32, i32
  }
}

</mosaic_0001>

<bundles_post_ra>
// kernel: tpu_custom_call.1
= control target key start
LH: loop header
LB: loop body
LE: loop exit
PB: predicated region body
PF: predicated region fallthrough
CT: control target
= control target key end

     0   :  { %12 = vsyncpa [#allocation4], 0  ;;  %s1556_s0 = inlined_call_operand.hbm [shape: bf16[2,8,32], index: 0, kind: input, shape index: {}]   ;;  %s1557_s1 = inlined_call_operand.hbm [shape: bf16[2,8,32], index: 1, kind: input, shape index: {}]   ;;  %s1558_s2 = inlined_call_operand.vmem [shape: bf16[32,64], index: 2, kind: input, shape index: {}]   ;;  %s1559_s3 = inlined_call_operand.vmem [shape: bf16[32,128], index: 3, kind: input, shape index: {}]   ;;  %s1560_s4 = inlined_call_operand.vmem [shape: bf16[4,8,8], index: 4, kind: input, shape index: {}]   ;;  %s1561_s5 = inlined_call_operand.vmem [shape: bf16[64,32], index: 5, kind: input, shape index: {}]   ;;  %s1562_s6 = inlined_call_operand.vmem [shape: f32[1,32], index: 6, kind: input, shape index: {}]   ;;  %s1563_s7 = inlined_call_operand.hbm [shape: f32[2,8,32], index: 7, kind: output, shape index: {}]  }
   0x1   :  { %14 = vsyncpa [#allocation4 + $0x1], 0 }
   0x2   :  { %15 = vsyncpa [#allocation7], 0 }
   0x3   :  { %17 = vsyncpa [#allocation7 + $0x1], 0 }
   0x4   :  { %18 = vsyncpa [#allocation5], 0 }
   0x5   :  { %20 = vsyncpa [#allocation5 + $0x1], 0  ;;  %s1341_s24 = smov 0   ;;  %s1343_s25 = smov 0  }
   0x6   :  { %s1345_s26 = smov 0   ;;  %s1347_s27 = smov 0  }
   0x7   :  { %s1349_s28 = smov 0   ;;  %s1351_s29 = smov 0  }
   0x8 LB: > { %1567 = sst [smem:[#allocation12_spill]] %s1280_s26  ;;  %s981_s30 = sadd.s32 4294967295, %s1292_s29   ;;  %s1292_s29 = sphi %s1351_s29, %s26_s29   ;;  %s1288_s28 = sphi %s1349_s28, %s1578_s28   ;;  %s1284_s27 = sphi %s1347_s27, %s1577_s27   ;;  %s1280_s26 = sphi %s1345_s26, %s1576_s26   ;;  %s1276_s25 = sphi %s1343_s25, %s1580_s25   ;;  %s1272_s24 = sphi %s1341_s24, %s1579_s24  }
   0x9   : > { %1568 = sst [smem:[#allocation13_spill]] %s1288_s28  ;;  %s982_s8 = sadd.s32 4294967294, %s1292_s29  }
   0xa   : > { %s38_s9 = sadd.s32 1, %s1288_s28  ;;  %s45_s10 = sadd.s32 1, %s1280_s26 }
   0xb   : > { %p40_p0 = scmp.ge.s32.totalorder %s38_s9, 2  ;;  %p52_p1 = scmp.ne.s32.totalorder %s1280_s26, %s1276_s25 }
   0xc   : > { %p53_p2 = scmp.eq.s32.totalorder %s1292_s29, 0  ;;  %p58_p3 = scmp.ne.s32.totalorder %s1276_s25, %s1272_s24 }
   0xd   : > { %s1582_s9 = smov (%p40_p0, %s38_s9), 0  ;;  %p59_p5 = scmp.eq.s32.totalorder %s981_s30, 0 }
   0xe   : > { %1569 = sst [smem:[#allocation14_spill]] %s1582_s9  ;;  %p1382_p4 = por %p53_p2, %p52_p1 }
   0xf   : > { %s42_s12 = ssub.s32 %s1288_s28, %s1582_s9  ;;  %p222_p6 = scmp.eq.s32.totalorder %s981_s30, 1 }
  0x10   : > { %p43_p7 = scmp.eq.s32.totalorder %s42_s12, 0  ;;  %p1388_p8 = por %p59_p5, %p58_p3 }
  0x11   : > { %p1392_p9 = por %p222_p6, %p52_p1  ;;  %p228_p10 = scmp.eq.s32.totalorder %s982_s8, 1 }
  0x12   : > { %s1397_s15 = scalar_select %p43_p7, %s1280_s26, %s45_s10  }
  0x13   : > { %p1399_p11 = por %p228_p10, %p58_p3  ;;  %p985_p12 = scmp.ge.s32.totalorder %s1292_s29, 2 }
  0x14   : > { %1573 = sst [smem:[#allocation15_spill]] %s1397_s15  ;;  %p1072_p13 = scmp.lt.s32.totalorder %s1292_s29, 2 }
  0x15   : > { %s267_s17 = sand.u32 1, %s1280_s26   ;;  %s987_s19 = sshll.u32 %s1288_s28, 2 }
  0x16   : > { %s986_s18 = sshll.u32 %s267_s17, 2  ;;  %s275_s22 = scalar_lea.hbm %s1556_s0, %s987_s19 }
  0x17   : > { %s271_s23 = scalar_lea.vmem [#allocation3], %s986_s18  ;;  %s277_s12 = sshll.u32 %s275_s22, 4  ;;  %s278_s12 = int_to_ptr.hbm [resolvable:$true] %s277_s12 }
  0x18   : > { %s279_s30 = sshll.u32 %s271_s23, 4  ;;  %p1062_p0 = pnand %p1072_p13, %p1382_p4  ;;  %s280_s30 = int_to_ptr.vmem [resolvable:$true] %s279_s30 }
  0x19   : > { %p990_p1 = scmp.ge.s32.totalorder %s1292_s29, 1  ;;  %p304_p2 = scmp.lt.s32.totalorder %s1292_s29, 3 }
  0x1a   : > { %s268_s8 = scalar_lea.sflag [#allocation4], %s267_s17  ;;  %s295_s28 = scalar_lea.hbm %s1557_s1, %s987_s19 }
  0x1b   : > { %1064 = dma.hbm_to_vmem [thread:$0]  (!%p1062_p0), %s278_s12, 64, %s280_s30, %s268_s8  }
  0x1c   : > { %p305_p3 = pnand %p990_p1, %p304_p2  ;;  %s290_s15 = scalar_lea.vmem [#allocation6], %s986_s18 }
  0x1d   : > { %s299_s26 = sshll.u32 %s290_s15, 4  ;;  %s297_s20 = sshll.u32 %s295_s28, 4  ;;  %s300_s26 = int_to_ptr.vmem [resolvable:$true] %s299_s26  ;;  %s298_s20 = int_to_ptr.hbm [resolvable:$true] %s297_s20 }
  0x1e   : > { %s287_s21 = scalar_lea.sflag [#allocation7], %s267_s17  ;;  %308 = sbr.rel (%p305_p3) target bundleno = 1427 (0x593), region = 48 }
  0x1f   : > { %1067 = dma.hbm_to_vmem [thread:$0]  (!%p1062_p0), %s298_s20, 64, %s300_s26, %s287_s21  }
  0x20   : > { %s1418_s11 = sand.u32 (!%p305_p3), 1, %s1276_s25  }
  0x21   : > { %s991_s22 = sshll.u32 (!%p305_p3), %s1418_s11, 2  ;;  %s311_s23 = scalar_lea.sflag (!%p305_p3), [#allocation4], %s1418_s11 }
  0x22   : > { %s314_s30 = scalar_lea.vmem (!%p305_p3), [#allocation3], %s991_s22 }
  0x23   : > { %1259 = dma.done.wait (%p1388_p8), %s311_s23, 64  }
  0x24   : > { %1261 = vsyncadd (%p1388_p8), %s311_s23, 4294967232  ;;  %s321_s28 = scalar_lea.sflag [#allocation7], %s1418_s11  ;;  %s324_s9 = scalar_lea.vmem [#allocation6], %s991_s22 }
  0x25   : > { %1263 = dma.done.wait (%p1388_p8), %s321_s28, 64  }
  0x26   : > { %1265 = vsyncadd (%p1388_p8), %s321_s28, 4294967232  ;;  %v1048_v0 = vld [vmem:[%s1559_s3 + $0x8] sm:$0xff]  ;;  %v1047_v2 = vld [vmem:[%s1559_s3] sm:$0xff]  ;;  %vm391_vm0 = vcmask 261120   ;;  %s1294_s13 = smov 112   ;;  %vm448_vm1 = vcmask 130048  }
  0x27   : > { %v1050_v1 = vld [vmem:[%s1558_s2 + $0x8] sm:$0xff]  ;;  %401 = vmatpush.bf16.msra.mxu0 %v1048_v0  ;;  %v1049_v3 = vld [vmem:[%s1558_s2] sm:$0xff]  ;;  %s1295_s20 = smov 80   ;;  %s1296_s21 = smov 64   ;;  %vm502_vm2 = vcmask 1043456   ;;  %vm468_vm3 = vcmask 64512  }
  0x28   : > { %437 = vmatpush.bf16.msra.mxu1 %v1050_v1  ;;  %v374_v4 = vld [vmem:[%s314_s30] sm:$0xf]  ;;  %v410_v5 = vld [vmem:[%s324_s9] sm:$0xf]  ;;  %s1297_s22 = smov 96   ;;  %s1298_s17 = smov 16  }
  0x29   : > { %v1051_v18 = vld [vmem:[%s1561_s5] sm:$0xff]  ;;  %v1027_v62 = vld [vmem:[%s1560_s4 + $0x8] sm:$0xff]   ;;  %s1299_s18 = smov 32   ;;  %s1300_s19 = smov 48  }
  0x2a   : > { %v446_v26 = vld [vmem:[%s1560_s4] sm:$0xff]   ;;  %v646_v63 = vunpack.c.l.bf16 %v1027_v62  ;;  %s1044_s23 = sshll.u32 %s1284_s27, 3  ;;  %s847_s27 = scalar_lea.sflag [#allocation5], %s1418_s11 }
  0x2b   : > { %402 = vmatpush.bf16.msra.mxu0 %v1047_v2  ;;  %v447_v27 = vunpack.c.l.bf16 %v446_v26  ;;  %v524_v56 = vunpack.c.h.bf16 %v446_v26  ;;  %s858_s9 = scalar_lea.hbm %s1563_s7, %s1044_s23 }
  0x2c   : > { %438 = vmatpush.bf16.msra.mxu1 %v1049_v3 }
  0x2e   : > { %1002 = vmatmul.msk.bf16.vlgmr.msra.gmra.mxu0 %vm391_vm0, %v374_v4 }
  0x2f   : > { %1011 = vmatmul.msk.bf16.vlgmr.msra.gmra.mxu1 %vm391_vm0, %v410_v5 }
  0xab   : > { %v404_v6 = vpop.f32.mrf.mxu0 }
  0xac   : > { %v440_v7 = vpop.f32.mrf.mxu1  ;;  %v408_v8 = vpack.c.bf16 %v404_v6, %v404_v6 }
  0xad   : > { %v444_v9 = vpack.c.bf16 %v440_v7, %v440_v7 }
  0xae   : > { %409 = vst [vmem:[#allocation2] sm:$0xf] %v408_v8  ;;  %v744_v8 = vunpack.c.h.bf16 %v1027_v62 }
  0xaf   : > { %v526_v10 = vunpack.c.l.b16 %v444_v9 }
  0xb1   : > { %v527_v11 = vpack.c.b16 %v526_v10, %v526_v10 }
  0xb3   : > { %528 = vrot.lane.b32.xlu2 %v527_v11, %s1294_s13  ;;  %v406_v12 = vpop.f32.mrf.mxu0 }
  0xb4   : > { %v442_v13 = vpop.f32.mrf.mxu1 }
  0xb5   : > { %v445_v14 = vld [vmem:[#allocation2] sm:$0xf] }
  0xb6   : > { %v453_v15 = vsel %vm448_vm1, %v445_v14, 0  ;;  %v495_v16 = vunpack.c.l.b16 %v445_v14 }
  0xb7   : > { %462 = vmatpush.bf16.xpose.msra.mxu2 %v453_v15 }
  0xb8   : > { %v1446_v17 = vpack.c.b16 %v495_v16, %v495_v16 }
  0xba   : > { %497 = vrot.lane.b32.xlu1 %v1446_v17, %s1296_s21 }
  0xbb   : > { %747 = vrot.lane.b32.xlu2 %v1446_v17, %s1295_s20 }
  0xbe   : > { %1012 = vmatmul.msk.bf16.vlgmr.msra.gmra.mxu2 %vm448_vm1, %v444_v9 }
  0xbf   : > { %638 = vmatpush.bf16.msrb.mxu2 %v1051_v18 }
  0xc2   : > { %530 = vrot.lane.b32.xlu1 %v1446_v17, %s1294_s13 }
  0xc3   : > { %647 = vrot.lane.b32.xlu2 %v527_v11, %s1297_s22 }
  0xca   : > { %745 = vrot.lane.b32.xlu1 %v527_v11, %s1295_s20  ;;  %s1226_s20 = scalar_lea.hbm %s1563_s7, 16 }
 0x10d   : > { %v529_v19 = vpop.permute.xlu2 %528 }
 0x115   : > { %v748_v20 = vpop.permute.xlu2 %747 }
 0x116   : > { %v753_v21 = vsel %vm448_vm1, %v748_v20, 0 }
 0x117   : > { %762 = vmatpush.bf16.xpose.msra.mxu2 %v753_v21 }
 0x11d   : > { %v648_v52 = vpop.permute.xlu2 %647 }
 0x12c   : > { %v498_v22 = vpop.permute.xlu1 %497 }
 0x12d   : > { %v504_v23 = vsel %vm502_vm2, %v498_v22, 0 }
 0x12e   : > { %513 = vmatpush.bf16.msra.mxu3 %v504_v23 }
 0x134   : > { %v531_v24 = vpop.permute.xlu1 %530 }
 0x135   : > { %v536_v25 = vsel %vm448_vm1, %v531_v24, 0 }
 0x136   : > { %545 = vmatpush.bf16.xpose.msrb.mxu3 %v536_v25 }
 0x13c   : > { %v746_v59 = vpop.permute.xlu1 %745 }
 0x141   : > { %v464_v28 = vpop.f32.mrf.mxu2 }
 0x142   : > { %v465_v29 = vadd.f32 %v464_v28, %v447_v27 }
 0x144   : > { %v469_v30 = vsel %vm468_vm3, %v465_v29, -inf }
 0x145   : > { %470 = vmax.xlane.f32.xlu0 %v469_v30 }
 0x149   : > { %v466_v31 = vpop.f32.mrf.mxu2 }
 0x1b8   : > { %v471_v32 = vpop.xlane.xlu0 %470 }
 0x1b9   : > { %v472_v33 = vsub.f32 %v465_v29, %v471_v32 }
 0x1bb   : > { %v473_v34 = vmul.f32 1.442695, %v472_v33 }
 0x1bd   : > { %1130 = vpow2.f32 %v473_v34 }
 0x1c3   : > { %v1131_v35 = vpop.eup %1130 }
 0x1c4   : > { %v475_v36 = vsel %vm468_vm3, %v1131_v35, 0.0 }
 0x1c5   : > { %476 = vadd.xlane.f32.xlu0 %v475_v36 }
 0x1d9   : > { %649 = vrot.lane.b32.xlu0 %v1446_v17, %s1297_s22  ;;  %s993_s22 = sshll.u32 %s1418_s11, 3 }
 0x238   : > { %v477_v37 = vpop.xlane.xlu0 %476 }
 0x239   : > { %1132 = vrcp.f32 %v477_v37  ;;  %v489_v41 = vand.u32 2147483648, %v477_v37  ;;  %v487_v43 = vand.u32 2147483647, %v477_v37  ;;  %vm483_vm5 = vweird.f32 %v477_v37 }
 0x23b   : > { %v490_v45 = vor.u32 1.1754944e-38, %v489_v41  ;;  %vm488_vm7 = vcmp.eq.f32.partialorder %v487_v43, 8.507059e+37 }
 0x23f   : > { %v1133_v38 = vpop.eup %1132 }
 0x240   : > { %v479_v39 = vmul.f32 %v1133_v38, %v477_v37  ;;  %vm484_vm4 = vweird.f32 %v1133_v38 }
 0x241   : > { %vm485_vm6 = vmor %vm483_vm5, %vm484_vm4 }
 0x242   : > { %v480_v40 = vsub.f32 1.0, %v479_v39 }
 0x244   : > { %v481_v42 = vmul.f32 %v1133_v38, %v480_v40 }
 0x246   : > { %v482_v44 = vadd.f32 %v1133_v38, %v481_v42 }
 0x248   : > { %v486_v46 = vsel %vm485_vm6, %v1133_v38, %v482_v44 }
 0x249   : > { %v491_v47 = vsel %vm488_vm7, %v490_v45, %v486_v46 }
 0x24a   : > { %v492_v48 = vmul.f32 %v1131_v35, %v491_v47 }
 0x24b   : > { %v650_v49 = vpop.permute.xlu0 %649 }
 0x24c   : > { %v655_v50 = vsel %vm448_vm1, %v650_v49, 0  ;;  %v493_v51 = vpack.c.bf16 %v492_v48, %v492_v48 }
 0x24e   : > { %1013 = vmatmul.msk.bf16.vlgmr.msra.gmra.mxu3 %vm468_vm3, %v493_v51 }
 0x24f   : > { %664 = vmatpush.bf16.xpose.msra.mxu3 %v655_v50 }
 0x25e   : > { %1015 = vmatmul.msk.bf16.vlgmr.msrb.gmra.mxu3 %vm448_vm1, %v529_v19 }
 0x26e   : > { %1028 = vmatmul.msk.bf16.vlgmr.msra.gmra.mxu3 %vm448_vm1, %v648_v52 }
 0x2d1   : > { %v515_v53 = vpop.f32.mrf.mxu3 }
 0x2d2   : > { %v519_v54 = vpack.c.bf16 %v515_v53, %v515_v53 }
 0x2d4   : > { %1026 = vmatmul.msk.bf16.vlgmr.msrb.gmra.mxu2 %vm448_vm1, %v519_v54 }
 0x2d9   : > { %v517_v55 = vpop.f32.mrf.mxu3 }
 0x2e1   : > { %v547_v57 = vpop.f32.mrf.mxu3 }
 0x2e2   : > { %v548_v58 = vadd.f32 %v547_v57, %v524_v56 }
 0x2e4   : > { %1036 = vmatmul.msk.bf16.vlgmr.msra.gmra.mxu2 %vm448_vm1, %v746_v59  ;;  %v551_v60 = vsel %vm468_vm3, %v548_v58, -inf }
 0x2e5   : > { %552 = vmax.xlane.f32.xlu1 %v551_v60 }
 0x2e9   : > { %v549_v61 = vpop.f32.mrf.mxu3 }
 0x2f1   : > { %v666_v0 = vpop.f32.mrf.mxu3 }
 0x2f2   : > { %v667_v1 = vadd.f32 %v666_v0, %v646_v63 }
 0x2f4   : > { %v670_v2 = vsel %vm468_vm3, %v667_v1, -inf }
 0x2f5   : > { %671 = vmax.xlane.f32.xlu0 %v670_v2 }
 0x2f9   : > { %v668_v3 = vpop.f32.mrf.mxu3 }
 0x309   : > { %793 = vrot.lane.b32.xlu0 %v1446_v17, %s1298_s17  ;;  %s364_s17 = scalar_lea.vmem [#allocation8], %s993_s22 }
 0x357   : > { %v1478_v4 = vpop.f32.mrf.mxu2 }
 0x358   : > { %v553_v5 = vpop.xlane.xlu1 %552 }
 0x359   : > { %v554_v7 = vsub.f32 %v548_v58, %v553_v5 }
 0x35b   : > { %v555_v9 = vmul.f32 1.442695, %v554_v7 }
 0x35d   : > { %1134 = vpow2.f32 %v555_v9  ;;  %v1052_v9 = vld [vmem:[%s1561_s5 + $0x8] sm:$0xff] }
 0x35e   : > { %616 = vmatpush.bf16.msrb.mxu1 %v1052_v9 }
 0x35f   : > { %v642_v6 = vpop.f32.mrf.mxu2 }
 0x363   : > { %v1481_v16 = vpop.eup %1134 }
 0x364   : > { %v557_v19 = vsel %vm468_vm3, %v1481_v16, 0.0 }
 0x367   : > { %v764_v10 = vpop.f32.mrf.mxu2 }
 0x368   : > { %v765_v11 = vadd.f32 %v764_v10, %v744_v8  ;;  %v672_v12 = vpop.xlane.xlu0 %671  ;;  %v1054_v8 = vld [vmem:[%s1561_s5 + $0x18] sm:$0xff]  ;;  %v1053_v10 = vld [vmem:[%s1561_s5 + $0x10] sm:$0xff] }
 0x369   : > { %v673_v13 = vsub.f32 %v667_v1, %v672_v12  ;;  %735 = vmatpush.bf16.msra.mxu1 %v1053_v10 }
 0x36a   : > { %v768_v14 = vsel %vm468_vm3, %v765_v11, -inf }
 0x36b   : > { %769 = vmax.xlane.f32.xlu2 %v768_v14  ;;  %v674_v15 = vmul.f32 1.442695, %v673_v13 }
 0x36d   : > { %1136 = vpow2.f32 %v674_v15 }
 0x36f   : > { %v766_v18 = vpop.f32.mrf.mxu2 }
 0x373   : > { %558 = vadd.xlane.f32.xlu2 %v557_v19  ;;  %v1485_v20 = vpop.eup %1136 }
 0x374   : > { %v676_v21 = vsel %vm468_vm3, %v1485_v20, 0.0 }
 0x37b   : > { %677 = vadd.xlane.f32.xlu2 %v676_v21  ;;  %v794_v22 = vpop.permute.xlu0 %793 }
 0x37c   : > { %v799_v23 = vsel %vm502_vm2, %v794_v22, 0 }
 0x37d   : > { %808 = vmatpush.bf16.msrb.mxu3 %v799_v23 }
 0x393   : > { %695 = vrot.lane.b32.xlu2 %v1446_v17, %s1299_s18  ;;  %s860_s18 = sshll.u32 %s364_s17, 4  ;;  %s861_s18 = int_to_ptr.vmem [resolvable:$true] %s860_s18 }
 0x3de   : > { %v770_v24 = vpop.xlane.xlu2 %769 }
 0x3df   : > { %v771_v25 = vsub.f32 %v765_v11, %v770_v24 }
 0x3e1   : > { %v772_v26 = vmul.f32 1.442695, %v771_v25 }
 0x3e3   : > { %1138 = vpow2.f32 %v772_v26 }
 0x3e6   : > { %v559_v29 = vpop.xlane.xlu2 %558 }
 0x3e7   : > { %1140 = vrcp.f32 %v559_v29  ;;  %v571_v43 = vand.u32 2147483648, %v559_v29  ;;  %vm565_vm11 = vweird.f32 %v559_v29  ;;  %v569_v45 = vand.u32 2147483647, %v559_v29 }
 0x3e9   : > { %v1139_v27 = vpop.eup %1138  ;;  %v572_v51 = vor.u32 1.1754944e-38, %v571_v43  ;;  %vm570_vm15 = vcmp.eq.f32.partialorder %v569_v45, 8.507059e+37 }
 0x3ea   : > { %v774_v28 = vsel %vm468_vm3, %v1139_v27, 0.0 }
 0x3eb   : > { %775 = vadd.xlane.f32.xlu1 %v774_v28  ;;  %v1129_v28 = vld [vmem:[%s1562_s6] ss:$0 sm:$0xff] }
 0x3ed   : > { %v1141_v30 = vpop.eup %1140 }
 0x3ee   : > { %v561_v32 = vmul.f32 %v1141_v30, %v559_v29  ;;  %v678_v34 = vpop.xlane.xlu2 %677  ;;  %vm566_vm9 = vweird.f32 %v1141_v30 }
 0x3ef   : > { %vm567_vm13 = vmor %vm565_vm11, %vm566_vm9  ;;  %v690_v0 = vand.u32 2147483648, %v678_v34  ;;  %vm684_vm5 = vweird.f32 %v678_v34  ;;  %v688_v1 = vand.u32 2147483647, %v678_v34 }
 0x3f0   : > { %v562_v33 = vsub.f32 1.0, %v561_v32 }
 0x3f1   : > { %v691_v3 = vor.u32 1.1754944e-38, %v690_v0  ;;  %vm689_vm7 = vcmp.eq.f32.partialorder %v688_v1, 8.507059e+37 }
 0x3f2   : > { %v563_v37 = vmul.f32 %v1141_v30, %v562_v33 }
 0x3f4   : > { %v564_v42 = vadd.f32 %v1141_v30, %v563_v37 }
 0x3f6   : > { %v568_v50 = vsel %vm567_vm13, %v1141_v30, %v564_v42  ;;  %v696_v56 = vpop.permute.xlu2 %695 }
 0x3f7   : > { %v573_v54 = vsel %vm570_vm15, %v572_v51, %v568_v50  ;;  %v701_v61 = vsel %vm502_vm2, %v696_v56, 0 }
 0x3f8   : > { %v574_v57 = vmul.f32 %v1481_v16, %v573_v54 }
 0x3fa   : > { %v575_v62 = vpack.c.bf16 %v574_v57, %v574_v57 }
 0x404   : > { %576 = vrot.lane.b32.xlu1 %v1446_v17, %s1300_s19  ;;  %s862_s19 = sshll.u32 %s858_s9, 4  ;;  %s863_s19 = int_to_ptr.hbm [resolvable:$true] %s862_s19 }
 0x405   : > { %s1220_s12 = sshra.s32 %s863_s19, 4  ;;  %s1221_s12 = int_to_ptr.hbm [resolvable:$true] %s1220_s12 }
 0x406   : > { %s1222_s8 = scalar_lea.hbm %s1221_s12, 8  ;;  %p1227_p7 = scmp.lt.s32.totalorder %s1221_s12, %s1563_s7 }
 0x407   : > { %p1223_p4 = scmp.ne.s32.totalorder %s1221_s12, %s1222_s8  ;;  %p1228_p8 = scmp.lt.s32.totalorder %s1226_s20, %s1222_s8 }
 0x409   : > { %p1224_p5 = pnand %p1223_p4, %p1392_p9  ;;  %p1229_p10 = por %p1228_p8, %p1227_p7 }
 0x40b   : > { %p1225_p6 = pneg %p1224_p5 }
 0x40d   : > { %p1230_p13 = pnand %p1229_p10, %p1225_p6 }
 0x45e   : > { %v776_v31 = vpop.xlane.xlu1 %775 }
 0x45f   : > { %1142 = vrcp.f32 %v776_v31  ;;  %v788_v39 = vand.u32 2147483648, %v776_v31  ;;  %v786_v41 = vand.u32 2147483647, %v776_v31  ;;  %vm782_vm10 = vweird.f32 %v776_v31 }
 0x460   : > { %1144 = vrcp.f32 %v678_v34 }
 0x461   : > { %v789_v46 = vor.u32 1.1754944e-38, %v788_v39  ;;  %vm787_vm14 = vcmp.eq.f32.partialorder %v786_v41, 8.507059e+37 }
 0x465   : > { %v1143_v35 = vpop.eup %1142 }
 0x466   : > { %v778_v36 = vmul.f32 %v1143_v35, %v776_v31  ;;  %vm783_vm8 = vweird.f32 %v1143_v35  ;;  %v1145_v17 = vpop.eup %1144 }
 0x467   : > { %vm784_vm12 = vmor %vm782_vm10, %vm783_vm8  ;;  %v680_v48 = vmul.f32 %v1145_v17, %v678_v34  ;;  %vm685_vm4 = vweird.f32 %v1145_v17 }
 0x468   : > { %v779_v38 = vsub.f32 1.0, %v778_v36  ;;  %vm686_vm6 = vmor %vm684_vm5, %vm685_vm4 }
 0x469   : > { %v681_v55 = vsub.f32 1.0, %v680_v48 }
 0x46a   : > { %v780_v40 = vmul.f32 %v1143_v35, %v779_v38 }
 0x46b   : > { %v682_v59 = vmul.f32 %v1145_v17, %v681_v55 }
 0x46c   : > { %v781_v44 = vadd.f32 %v1143_v35, %v780_v40 }
 0x46d   : > { %v683_v63 = vadd.f32 %v1145_v17, %v682_v59 }
 0x46e   : > { %v785_v47 = vsel %vm784_vm12, %v1143_v35, %v781_v44 }
 0x46f   : > { %v790_v49 = vsel %vm787_vm14, %v789_v46, %v785_v47  ;;  %v687_v2 = vsel %vm686_vm6, %v1145_v17, %v683_v63 }
 0x470   : > { %v791_v52 = vmul.f32 %v1139_v27, %v790_v49  ;;  %v692_v5 = vsel %vm689_vm7, %v691_v3, %v687_v2 }
 0x471   : > { %v693_v6 = vmul.f32 %v1485_v20, %v692_v5 }
 0x472   : > { %v792_v53 = vpack.c.bf16 %v791_v52, %v791_v52 }
 0x473   : > { %v694_v7 = vpack.c.bf16 %v693_v6, %v693_v6 }
 0x474   : > { %1037 = vmatmul.msk.bf16.vlgmr.msrb.gmra.mxu3 %vm468_vm3, %v792_v53 }
 0x476   : > { %v577_v58 = vpop.permute.xlu1 %576 }
 0x477   : > { %v582_v60 = vsel %vm502_vm2, %v577_v58, 0 }
 0x478   : > { %591 = vmatpush.bf16.msrb.mxu0 %v582_v60 }
 0x47b   : > { %1016 = vmatmul.msk.bf16.vlgmr.msrb.gmra.mxu0 %vm468_vm3, %v575_v62 }
 0x47c   : > { %710 = vmatpush.bf16.msra.mxu0 %v701_v61 }
 0x480   : > { %833 = vmatpush.bf16.msrb.mxu0 %v1054_v8 }
 0x48b   : > { %1029 = vmatmul.msk.bf16.vlgmr.msra.gmra.mxu0 %vm468_vm3, %v694_v7 }
 0x4f7   : > { %v810_v11 = vpop.f32.mrf.mxu3 }
 0x4f8   : > { %v814_v12 = vpack.c.bf16 %v810_v11, %v810_v11  ;;  %v593_v13 = vpop.f32.mrf.mxu0 }
 0x4f9   : > { %v597_v14 = vpack.c.bf16 %v593_v13, %v593_v13 }
 0x4fa   : > { %1042 = vmatmul.msk.bf16.vlgmr.msrb.gmra.mxu0 %vm448_vm1, %v814_v12 }
 0x4fb   : > { %1021 = vmatmul.msk.bf16.vlgmr.msrb.gmra.mxu1 %vm448_vm1, %v597_v14 }
 0x4ff   : > { %v812_v15 = vpop.f32.mrf.mxu3 }
 0x500   : > { %v595_v16 = vpop.f32.mrf.mxu0 }
 0x508   : > { %v712_v18 = vpop.f32.mrf.mxu0 }
 0x509   : > { %v716_v19 = vpack.c.bf16 %v712_v18, %v712_v18 }
 0x50b   : > { %1034 = vmatmul.msk.bf16.vlgmr.msra.gmra.mxu1 %vm448_vm1, %v716_v19 }
 0x510   : > { %v714_v20 = vpop.f32.mrf.mxu0 }
 0x577   : > { %v835_v21 = vpop.f32.mrf.mxu0 }
 0x578   : > { %v618_v22 = vpop.f32.mrf.mxu1 }
 0x579   : > { %v641_v25 = vadd.f32 %v1478_v4, %v618_v22 }
 0x57f   : > { %v837_v23 = vpop.f32.mrf.mxu0 }
 0x580   : > { %v620_v24 = vpop.f32.mrf.mxu1 }
 0x588   : > { %v737_v26 = vpop.f32.mrf.mxu1 }
 0x589   : > { %v741_v27 = vadd.f32 %v737_v26, %v641_v25 }
 0x58b   : > { %v839_v29 = vadd.f32 %v835_v21, %v741_v27 }
 0x58d   : > { %v844_v30 = vadd.f32 %v1129_v28, %v839_v29 }
 0x58f   : > { %845 = vst.msk [vmem:[%s364_s17] sm:$0xff] %vm391_vm0, %v844_v30 }
 0x590   : > { %v739_v4 = vpop.f32.mrf.mxu1 }
 0x591   : > { %1233 = shalt.err (!%p1230_p13)
}
 0x592   : > { %1059 = dma.vmem_to_hbm [thread:$0]  (%p1392_p9), %s861_s18, 128, %s863_s19, %s847_s27  }
 0x593 PF: > { %s874_s11 = sand.u32 1, %s1272_s24   ;;  %p1069_p0 = pnand %p985_p12, %p1399_p11 }
 0x594   : > { %s875_s23 = scalar_lea.sflag [#allocation5], %s874_s11 }
 0x595   : > { %p1070_p1 = pneg %p1069_p0 }
 0x597   : > { %1267 = dma.done.wait (%p1070_p1), %s875_s23, 128  }
 0x598   : > { %1269 = vsyncadd (%p1070_p1), %s875_s23, 4294967168  ;;  %s26_s29 = sadd.s32 1, %s1292_s29   ;;  %s1575_s30 = sld [smem:[#allocation12_spill]] }
 0x599   : > { %p23_p2 = scmp.ge.s32.totalorder %s26_s29, 4   ;;  %s1576_s26 = sld [smem:[#allocation15_spill]] }
 0x59a   : > { %s1577_s27 = sld [smem:[#allocation13_spill]]  ;;  %s1579_s24 = smov %s1276_s25 }
 0x59b   : > { %s1578_s28 = sld [smem:[#allocation14_spill]]  ;;  %25 = sbr.rel (!%p23_p2) target bundleno = 8 (0x8), region = 116 }
 0x59e   : > { %s1580_s25 = smov %s1575_s30 }
 0x5a0   :  { %881 = vsyncpa [#allocation4], 1 }
 0x5a1   :  { %883 = vsyncpa [#allocation4 + $0x1], 1 }
 0x5a2   :  { %884 = vsyncpa [#allocation7], 1 }
 0x5a3   :  { %886 = vsyncpa [#allocation7 + $0x1], 1 }
 0x5a4   :  { %887 = vsyncpa [#allocation5], 1 }
 0x5a5   :  { %889 = vsyncpa [#allocation5 + $0x1], 1 }

</bundles_post_ra>
